<compile_context>
chip_gen: v6e
topology: v6e:2x2x1
jax: 0.10.0
libtpu: 0.0.40
codegen_flags: <defaults>
</compile_context>

<pallas_src>
import functools

import jax
import jax.numpy as jnp
from jax.experimental import pallas as pl
from jax.experimental.pallas import tpu as pltpu


def _round_up(x, m):
    return (x + m - 1) // m * m


def _conv_bn_relu_kernel(x_ref, halo_ref, w_ref, shift_ref, o_ref, *,
                         kernel_size, length, per_tap):
    """One grid step == one (batch sample, length tile).

    x_ref     : (1, C, TL)                 input tile (compute dtype)
    halo_ref  : (1, n_tiles, C, 2*pad)     per-sample halos, VMEM-resident over j
    w_ref     : (H, K*C) or (K, H, C)      conv weight, BN scale folded
    shift_ref : (H, 1) f32                 folded BN shift (+ conv bias)
    o_ref     : (1, H, TL)                 output tile
    """
    K = kernel_size
    pad = K // 2
    C = x_ref.shape[1]
    TL = x_ref.shape[2]
    H = o_ref.shape[1]
    n_tiles = halo_ref.shape[1]

    x = x_ref[0]                                            # (C, TL)

    # Ragged last tile: zero the columns past the true length (trace-time branch).
    if length % TL != 0:
        j = pl.program_id(1)
        col = jax.lax.broadcasted_iota(jnp.int32, (C, TL), 1)
        x = jnp.where(j * TL + col < length, x, jnp.zeros_like(x))

    # Halo columns for this tile (all zeros at the sequence ends -> 'same' padding).
    if pad > 0:
        if n_tiles > 1:
            halo = halo_ref[0, pl.program_id(1)]            # (C, 2*pad)
        else:
            halo = halo_ref[0, 0]                           # (C, 2*pad)
        window = jnp.concatenate([halo[:, :pad], x, halo[:, pad:]], axis=1)
    else:
        window = x                                          # (C, TL + 2*pad)

    shift = shift_ref[...]                                  # (H, 1) f32

    if per_tap:
        # Large C: per-tap accumulate, no im2col patch in VMEM; accumulator is
        # initialized with the BN shift so there is no epilogue add.
        acc = jnp.broadcast_to(shift, (H, TL))
        for k in range(K):
            acc = acc + jnp.dot(w_ref[k], window[:, k:k + TL],
                                preferred_element_type=jnp.float32)
        y = jnp.maximum(acc, 0.0)
    else:
        # Small K*C: one fused MXU matmul over the K*C contraction.
        patch = jnp.concatenate([window[:, k:k + TL] for k in range(K)], axis=0)
        acc = jnp.dot(w_ref[...], patch, preferred_element_type=jnp.float32)
        y = jnp.maximum(acc + shift, 0.0)

    # Dropout in eval mode is identity.
    o_ref[0] = y.astype(o_ref.dtype)


def _choose_tile(length, c_pad, hidden, kernel_size, out_itemsize, per_tap):
    """Generation-aware (VMEM-aware) length-tile and vmem_limit selection."""
    vmem_cap = 64 * 1024 * 1024
    try:
        vmem_cap = int(getattr(pltpu.get_tpu_info(), "vmem_capacity_bytes",
                               vmem_cap))
    except Exception:
        pass
    # ~40% of physical VMEM for the double-buffered working set; the rest is
    # headroom for compiler temps.  v5e/v6e: 128 MiB -> TL up to 2048;
    # v7x: 64 MiB per TC -> TL capped at 1024.
    budget = int(vmem_cap * 0.4)
    cap = 2048 if vmem_cap >= (100 << 20) else 1024

    def footprint(tl):
        per_col = (2 * 2 * c_pad                 # double-buffered bf16 input tile
                   + 2 * out_itemsize * hidden   # double-buffered output tile
                   + 2 * c_pad                   # window temp
                   + 4 * hidden)                 # f32 accumulator
        if not per_tap:
            per_col += 2 * kernel_size * c_pad   # im2col patch
        return tl * per_col + 2 * 2 * hidden * kernel_size * c_pad  # + weights

    if length <= cap and footprint(_round_up(length, 128)) <= budget:
        tl = length                              # single whole-length tile
    else:
        tl = cap
        while tl > 128 and footprint(tl) > budget:
            tl -= 128

    vmem_limit = max(32 << 20, int(vmem_cap * 0.75))
    return tl, vmem_limit


@functools.partial(jax.jit,
                   static_argnames=("kernel_size", "eps", "compute_dtype",
                                    "out_dtype"))
def conv1d_bn_relu_dropout(x, weight, bias, gamma, beta, running_mean,
                           running_var, *, kernel_size=5, eps=1e-5,
                           compute_dtype=jnp.bfloat16, out_dtype=None):
    """x: (N, C, L).  weight: (H, C, K).  Returns (N, H, L) in out_dtype (def. x.dtype)."""
    N, C, L = x.shape
    H = weight.shape[0]
    K = kernel_size
    assert K % 2 == 1, "module uses 'same' padding (odd kernel)"
    pad = K // 2
    out_dtype = x.dtype if out_dtype is None else out_dtype

    # Channel padding to the packed-sublane granule (clean MXU operand layout).
    granule = 16 if compute_dtype == jnp.bfloat16 else 8
    C_pad = _round_up(C, granule)

    # ---- fold conv bias + BatchNorm (inference) into weight scale / shift ----
    inv_std = jax.lax.rsqrt(running_var + eps)                     # (H,)
    scale = gamma * inv_std                                        # (H,)
    shift = (beta + (bias - running_mean) * scale).reshape(H, 1)
    shift = shift.astype(jnp.float32)                              # (H, 1)

    w = jnp.transpose(weight, (0, 2, 1)) * scale[:, None, None]    # (H, K, C)
    if C_pad != C:
        w = jnp.pad(w, ((0, 0), (0, 0), (0, C_pad - C)))           # (H, K, C_pad)

    # ---- tiling decisions (all static at trace time) ----
    per_tap = (K * C_pad > 256)          # beyond the MXU contraction granule
    TL, vmem_limit = _choose_tile(L, C_pad, H, K,
                                  jnp.dtype(out_dtype).itemsize, per_tap)
    n_tiles = -(-L // TL)

    if per_tap:
        w_op = jnp.transpose(w, (1, 0, 2)).astype(compute_dtype)   # (K, H, C_pad)
    else:
        w_op = w.reshape(H, K * C_pad).astype(compute_dtype)       # (H, K*C_pad)

    # Input in compute dtype; only the (cheap) channel pad, NO length pad.
    xc = x.astype(compute_dtype)
    if C_pad != C:
        xc = jnp.pad(xc, ((0, 0), (0, C_pad - C), (0, 0)))         # (N, C_pad, L)

    # ---- halos: 2*pad columns per interior tile boundary (zeros at the ends) ----
    halo_w = max(2 * pad, 1)
    if n_tiles == 1 or pad == 0:
        halo = jnp.zeros((N, n_tiles, C_pad, halo_w), compute_dtype)
    else:
        # One strided gather around each interior boundary j*TL (j = 1..n_tiles-1):
        # columns [j*TL - pad, j*TL + pad).
        gcol = (jnp.arange(1, n_tiles)[:, None] * TL - pad) + jnp.arange(2 * pad)[None, :]
        slab = jnp.where((gcol < L)[None, None, :, :],
                         xc[:, :, jnp.clip(gcol, 0, L - 1)],
                         0).astype(compute_dtype)                  # (N, C_pad, n_tiles-1, 2*pad)
        zcol = jnp.zeros((N, C_pad, 1, pad), compute_dtype)
        left = jnp.concatenate([zcol, slab[..., :pad]], axis=2)    # left halo of tile t
        right = jnp.concatenate([slab[..., pad:], zcol], axis=2)   # right halo of tile t
        halo = jnp.transpose(jnp.concatenate([left, right], axis=3),
                             (0, 2, 1, 3))                         # (N, n_tiles, C_pad, 2*pad)

    kernel = functools.partial(_conv_bn_relu_kernel,
                               kernel_size=K, length=L, per_tap=per_tap)

    out = pl.pallas_call(
        kernel,
        out_shape=jax.ShapeDtypeStruct((N, H, L), out_dtype),
        grid_spec=pltpu.PrefetchScalarGridSpec(
            num_scalar_prefetch=0,
            grid=(N, n_tiles),
            in_specs=[
                # main input tile
                pl.BlockSpec((1, C_pad, TL), lambda n, j: (n, 0, j)),
                # whole-per-sample halo: constant in j -> stays VMEM-resident
                pl.BlockSpec((1, n_tiles, C_pad, halo_w),
                             lambda n, j: (n, 0, 0, 0)),
                # fused weight (constant index -> fetched once)
                pl.BlockSpec(w_op.shape, lambda n, j: (0,) * w_op.ndim),
                # folded BN shift
                pl.BlockSpec((H, 1), lambda n, j: (0, 0)),
            ],
            out_specs=pl.BlockSpec((1, H, TL), lambda n, j: (n, 0, j)),
        ),
        compiler_params=pltpu.CompilerParams(
            dimension_semantics=("parallel", "parallel"),
            vmem_limit_bytes=vmem_limit),
    )(xc, halo, w_op, shift)

    return out


def _reference(x, weight, bias, gamma, beta, running_mean, running_var,
               kernel_size=5, eps=1e-5):
    """Pure-JAX f32 reference of the same inference-mode forward pass."""
    pad = kernel_size // 2
    out = jax.lax.conv_general_dilated(
        x, weight, window_strides=(1,), padding=[(pad, pad)],
        dimension_numbers=("NCH", "OIH", "NCH"))
    out = out + bias[None, :, None]
    inv_std = jax.lax.rsqrt(running_var + eps)
    out = (out - running_mean[None, :, None]) * (gamma * inv_std)[None, :, None] \
        + beta[None, :, None]
    return jnp.maximum(out, 0.0)


if __name__ == "__main__":
    # Small shapes consistent with the module: batch=2, in_channels=4,
    # length=16, hidden_dims=32, kernel_size=5.
    N, C, L, H, K = 2, 4, 16, 32, 5

    key = jax.random.PRNGKey(0)
    kx, kw, kb, kg, kbe, km, kv = jax.random.split(key, 7)

    x = jax.random.normal(kx, (N, C, L), dtype=jnp.float32)
    weight = jax.random.normal(kw, (H, C, K), dtype=jnp.float32) * 0.1
    bias = jax.random.normal(kb, (H,), dtype=jnp.float32) * 0.1
    gamma = 1.0 + 0.1 * jax.random.normal(kg, (H,), dtype=jnp.float32)
    beta = 0.1 * jax.random.normal(kbe, (H,), dtype=jnp.float32)
    running_mean = 0.1 * jax.random.normal(km, (H,), dtype=jnp.float32)
    running_var = jax.random.uniform(kv, (H,), dtype=jnp.float32,
                                     minval=0.5, maxval=1.5)

    out = conv1d_bn_relu_dropout(x, weight, bias, gamma, beta,
                                 running_mean, running_var, kernel_size=K)
    out = jax.block_until_ready(out)

    ref = _reference(x, weight, bias, gamma, beta, running_mean, running_var,
                     kernel_size=K)
    assert out.shape == (N, H, L)
    # bf16 matmul operands -> tolerance reflects bf16 rounding of x and w.
    assert jnp.allclose(out, ref, atol=3e-2, rtol=3e-2), "mismatch vs reference"

    print("KERNEL_OK")
</pallas_src>

<mosaic_0001>
module attributes {stable_mosaic.version = 11 : i64} {
  func.func @_conv_bn_relu_kernel(%arg0: i32, %arg1: i32, %arg2: memref<1x16x16xbf16, #tpu.memory_space<vmem>>, %arg3: memref<1x1x16x4xbf16, #tpu.memory_space<vmem>>, %arg4: memref<32x80xbf16, #tpu.memory_space<vmem>>, %arg5: memref<32x1xf32, #tpu.memory_space<vmem>>, %arg6: memref<1x32x16xf32, #tpu.memory_space<vmem>>) attributes {dimension_semantics = [#tpu.dimension_semantics<parallel>, #tpu.dimension_semantics<parallel>], iteration_bounds = array<i64: 2, 1>, scalar_prefetch = 0 : i64, scratch_operands = 0 : i64, tpu.core_type = #tpu.core_type<tc>, window_params = [{transform_indices = @transform_0, window_bounds = array<i64: 1, 16, 16>}, {transform_indices = @transform_1, window_bounds = array<i64: 1, 1, 16, 4>}, {pipeline_mode = #tpu.pipeline_mode<synchronous>, transform_indices = @transform_2, window_bounds = array<i64: 32, 80>}, {pipeline_mode = #tpu.pipeline_mode<synchronous>, transform_indices = @transform_3, window_bounds = array<i64: 32, 1>}, {transform_indices = @transform_4, window_bounds = array<i64: 1, 32, 16>}]} {
    %c0 = arith.constant 0 : index
    %c0_0 = arith.constant 0 : index
    %c0_1 = arith.constant 0 : index
    %0 = vector.load %arg2[%c0, %c0_0, %c0_1] : memref<1x16x16xbf16, #tpu.memory_space<vmem>>, vector<1x16x16xbf16>
    %1 = vector.shape_cast %0 : vector<1x16x16xbf16> to vector<16x16xbf16>
    %c0_2 = arith.constant 0 : index
    %c0_3 = arith.constant 0 : index
    %c0_4 = arith.constant 0 : index
    %c0_5 = arith.constant 0 : index
    %2 = vector.load %arg3[%c0_2, %c0_3, %c0_4, %c0_5] : memref<1x1x16x4xbf16, #tpu.memory_space<vmem>>, vector<1x1x16x4xbf16>
    %3 = vector.shape_cast %2 : vector<1x1x16x4xbf16> to vector<16x4xbf16>
    %4 = vector.extract_strided_slice %3 {offsets = [0, 0], sizes = [16, 2], strides = [1, 1]} : vector<16x4xbf16> to vector<16x2xbf16>
    %5 = vector.extract_strided_slice %3 {offsets = [0, 2], sizes = [16, 2], strides = [1, 1]} : vector<16x4xbf16> to vector<16x2xbf16>
    %6 = tpu.concatenate %4, %1, %5 in 1 : vector<16x2xbf16>, vector<16x16xbf16>, vector<16x2xbf16> -> vector<16x20xbf16>
    %c0_6 = arith.constant 0 : index
    %c0_7 = arith.constant 0 : index
    %7 = vector.load %arg5[%c0_6, %c0_7] : memref<32x1xf32, #tpu.memory_space<vmem>>, vector<32x1xf32>
    %8 = vector.extract_strided_slice %6 {offsets = [0, 0], sizes = [16, 16], strides = [1, 1]} : vector<16x20xbf16> to vector<16x16xbf16>
    %9 = vector.extract_strided_slice %6 {offsets = [0, 1], sizes = [16, 16], strides = [1, 1]} : vector<16x20xbf16> to vector<16x16xbf16>
    %10 = vector.extract_strided_slice %6 {offsets = [0, 2], sizes = [16, 16], strides = [1, 1]} : vector<16x20xbf16> to vector<16x16xbf16>
    %11 = vector.extract_strided_slice %6 {offsets = [0, 3], sizes = [16, 16], strides = [1, 1]} : vector<16x20xbf16> to vector<16x16xbf16>
    %12 = vector.extract_strided_slice %6 {offsets = [0, 4], sizes = [16, 16], strides = [1, 1]} : vector<16x20xbf16> to vector<16x16xbf16>
    %13 = tpu.concatenate %8, %9, %10, %11, %12 in 0 : vector<16x16xbf16>, vector<16x16xbf16>, vector<16x16xbf16>, vector<16x16xbf16>, vector<16x16xbf16> -> vector<80x16xbf16>
    %c0_8 = arith.constant 0 : index
    %c0_9 = arith.constant 0 : index
    %14 = vector.load %arg4[%c0_8, %c0_9] : memref<32x80xbf16, #tpu.memory_space<vmem>>, vector<32x80xbf16>
    %cst = arith.constant dense<0.000000e+00> : vector<32x16xf32>
    %15 = tpu.matmul %14, %13, %cst {dimension_numbers = #tpu.dot_dimension_numbers<[1], [0], [0], [1], [0, 0, 1, 1], [], []>} : vector<32x80xbf16>, vector<80x16xbf16>, vector<32x16xf32> -> vector<32x16xf32>
    %16 = vector.broadcast %7 : vector<32x1xf32> to vector<32x16xf32>
    %17 = arith.addf %15, %16 : vector<32x16xf32>
    %cst_10 = arith.constant 0.000000e+00 : f32
    %18 = vector.broadcast %cst_10 : f32 to vector<32x16xf32>
    %19 = arith.maximumf %17, %18 : vector<32x16xf32>
    %c0_11 = arith.constant 0 : index
    %c0_12 = arith.constant 0 : index
    %c0_13 = arith.constant 0 : index
    %20 = vector.load %arg6[%c0_11, %c0_12, %c0_13] : memref<1x32x16xf32, #tpu.memory_space<vmem>>, vector<1x32x16xf32>
    %21 = vector.shape_cast %20 : vector<1x32x16xf32> to vector<32x16xf32>
    %22 = vector.shape_cast %19 : vector<32x16xf32> to vector<1x32x16xf32>
    tpu.vector_store %arg6[%c0_11, %c0_12, %c0_13], %22 {strides = array<i32>} : memref<1x32x16xf32, #tpu.memory_space<vmem>>, vector<1x32x16xf32>,
    return
  }
  func.func @transform_0(%arg0: i32, %arg1: i32) -> (i32, i32, i32) {
    %c0_i32 = arith.constant 0 : i32
    %c0_i32_0 = arith.constant 0 : i32
    return %arg0, %c0_i32, %arg1 : i32, i32, i32
  }
  func.func @transform_1(%arg0: i32, %arg1: i32) -> (i32, i32, i32, i32) {
    %c0_i32 = arith.constant 0 : i32
    %c0_i32_0 = arith.constant 0 : i32
    %c0_i32_1 = arith.constant 0 : i32
    %c0_i32_2 = arith.constant 0 : i32
    return %arg0, %c0_i32, %c0_i32_0, %c0_i32_1 : i32, i32, i32, i32
  }
  func.func @transform_2(%arg0: i32, %arg1: i32) -> (i32, i32) {
    %c0_i32 = arith.constant 0 : i32
    %c0_i32_0 = arith.constant 0 : i32
    %c0_i32_1 = arith.constant 0 : i32
    return %c0_i32, %c0_i32_0 : i32, i32
  }
  func.func @transform_3(%arg0: i32, %arg1: i32) -> (i32, i32) {
    %c0_i32 = arith.constant 0 : i32
    %c0_i32_0 = arith.constant 0 : i32
    %c0_i32_1 = arith.constant 0 : i32
    return %c0_i32, %c0_i32_0 : i32, i32
  }
  func.func @transform_4(%arg0: i32, %arg1: i32) -> (i32, i32, i32) {
    %c0_i32 = arith.constant 0 : i32
    %c0_i32_0 = arith.constant 0 : i32
    return %arg0, %c0_i32, %arg1 : i32, i32, i32
  }
}

</mosaic_0001>

<bundles_post_ra>
// kernel: conv1d_bn_relu_dropout.1
= control target key start
LH: loop header
LB: loop body
LE: loop exit
PB: predicated region body
PF: predicated region fallthrough
CT: control target
= control target key end

     0   :  { %s623_s15 = smov 0   ;;  %s625_s16 = smov 0   ;;  %s683_s0 = inlined_call_operand.vmem [shape: bf16[2,16,16], index: 0, kind: input, shape index: {}]   ;;  %s684_s1 = inlined_call_operand.vmem [shape: bf16[2,1,16,4], index: 1, kind: input, shape index: {}]   ;;  %s685_s2 = inlined_call_operand.vmem [shape: bf16[32,80], index: 2, kind: input, shape index: {}]   ;;  %s686_s3 = inlined_call_operand.vmem [shape: f32[32,1], index: 3, kind: input, shape index: {}]   ;;  %s687_s4 = inlined_call_operand.vmem [shape: f32[2,32,16], index: 4, kind: output, shape index: {}]  }
   0x1   :  { %s627_s17 = smov 0  }
   0x2 LB: > { %s26_s18 = sadd.s32 1, %s585_s16  ;;  %p491_p0 = scmp.ge.s32.totalorder %s589_s17, 1  ;;  %s589_s17 = sphi %s627_s17, %s14_s17   ;;  %s585_s16 = sphi %s625_s16, %s689_s16   ;;  %s581_s15 = sphi %s623_s15, %s688_s15  }
   0x3   : > { %p28_p1 = scmp.ge.s32.totalorder %s26_s18, 2  ;;  %p191_p2 = scmp.lt.s32.totalorder %s589_s17, 3 }
   0x5   : > { %s691_s18 = smov (%p28_p1, %s26_s18), 0  ;;  %p192_p3 = pnand %p491_p0, %p191_p2 }
   0x6   : > { %p228_p4 = scmp.lt.s32.totalorder (!%p192_p3), %s581_s15, 1  ;;  %s591_s26 = smov (!%p192_p3), 2  }
   0x7   : > { %195 = sbr.rel (%p192_p3) target bundleno = 475 (0x1db), region = 36  ;;  %s592_s27 = smov (!%p192_p3), 16  }
   0x8   : > { %s593_s28 = smov (!%p192_p3), 126   ;;  %s594_s29 = smov (!%p192_p3), 124  }
   0x9   : > { %s595_s30 = smov (!%p192_p3), 125   ;;  %s596_s9 = smov (!%p192_p3), 127  }
   0xc   : > { %s693_s15 = smov (!%p228_p4, %s581_s15), 1  ;;  %vm268_vm0 = vcmask 15360   ;;  %vm272_vm1 = vcmask 146432   ;;  %v565_v6 = vld [vmem:[%s685_s2] sm:$0xff]   ;;  %vm327_vm2 = vcmask 654336   ;;  %v597_v8 = vmov 0  }
   0xd   : > { %s506_s19 = sshll.u32 %s693_s15, 3  ;;  %526 = vmatprep.mubr.msk.bf16.mxu0 %vm327_vm2, %v565_v6  ;;  %v276_v7 = vld [vmem:[%s686_s3] sm:$0xff]  ;;  %561 = vset.pattern.permute.xlu0 %v597_v8  ;;  %v277_v9 = vld [vmem:[%s686_s3 + $0x8] sm:$0xff]  ;;  %v279_v10 = vld [vmem:[%s686_s3 + $0x18] sm:$0xff]  ;;  %vm387_vm3 = vcmask 130048  }
   0xe   : > { %s235_s22 = scalar_lea.vmem %s683_s0, %s506_s19  ;;  %s240_s25 = scalar_lea.vmem %s684_s1, %s506_s19  ;;  %562 = vset.pattern.permute.xlu1 %v597_v8  ;;  %v278_v11 = vld [vmem:[%s686_s3 + $0x10] sm:$0xff]  ;;  %v566_v16 = vld [vmem:[%s685_s2 + $0x8] sm:$0xff]  }
   0xf   : > { %v563_v0 = vld [vmem:[%s235_s22] sm:$0xff]   ;;  %s508_s22 = sshll.u32 %s693_s15, 5 }
  0x10   : > { %264 = vrot.lane.b32.xlu0 %v563_v0, %s591_s26  ;;  %v564_v1 = vld [vmem:[%s240_s25] sm:$0xff]   ;;  %s248_s25 = scalar_lea.vmem %s687_s4, %s508_s22 }
  0x14   : > { %266 = vrot.lane.b32.xlu0 %v564_v1, %s592_s27 }
  0x82   : > { %v265_v2 = vpop.permute.xlu0 %264 }
  0x83   : > { %v271_v3 = vsel %vm268_vm0, %v564_v1, %v265_v2 }
  0x86   : > { %v267_v4 = vpop.permute.xlu0 %266 }
  0x87   : > { %v274_v5 = vsel %vm272_vm1, %v271_v3, %v267_v4 }
  0x88   : > { %284 = vrot.lane.b32.xlu0 %v274_v5, %s593_s28  ;;  %290 = vrot.lane.b32.xlu1 %v274_v5, %s594_s29 }
  0x8c   : > { %287 = vrot.lane.b32.xlu1 %v274_v5, %s595_s30  ;;  %299 = vperm.xlu0 %561, %v276_v7  }
  0x90   : > { %281 = vrot.lane.b32.xlu1 %v274_v5, %s596_s9  ;;  %314 = vperm.xlu0 %561, %v279_v10  }
  0x94   : > { %304 = vperm.xlu1 %562, %v277_v9  }
  0x98   : > { %309 = vperm.xlu1 %562, %v278_v11  }
  0xfa   : > { %v291_v12 = vpop.permute.xlu1 %290  ;;  %v285_v14 = vpop.permute.xlu0 %284 }
  0xfb   : > { %516 = vmatprep.subr.bf16.mxu0 %v291_v12 }
  0xfc   : > { %517 = vmatpush3.bf16.msra.mxu0 %v291_v12 }
  0xfe   : > { %v288_v13 = vpop.permute.xlu1 %287 }
  0xff   : > { %518 = vmatprep.subr.bf16.mxu0 %v288_v13 }
 0x100   : > { %519 = vmatpush3.bf16.msra.mxu0 %v288_v13 }
 0x101   : > { %520 = vmatprep.subr.bf16.mxu0 %v285_v14 }
 0x102   : > { %v282_v15 = vpop.permute.xlu1 %281 }
 0x104   : > { %521 = vmatpush3.bf16.msra.mxu0 %v285_v14 }
 0x105   : > { %522 = vmatprep.subr.bf16.mxu0 %v282_v15 }
 0x107   : > { %v300_v18 = vpop.permute.xlu0 %299 }
 0x108   : > { %523 = vmatpush3.bf16.msra.mxu0 %v282_v15 }
 0x109   : > { %524 = vmatprep.subr.bf16.mxu0 %v274_v5 }
 0x10b   : > { %v315_v25 = vpop.permute.xlu0 %314 }
 0x10c   : > { %525 = vmatpush3.bf16.msra.mxu0 %v274_v5 }
 0x10f   : > { %527 = vmatmul.mubr.msk.bf16.vlgmr.msra.gmra.mxu0 %vm327_vm2, %v566_v16  ;;  %v305_v17 = vpop.permute.xlu1 %304 }
 0x113   : > { %v310_v19 = vpop.permute.xlu1 %309 }
 0x1cf   : > { %v528_v20 = vpop.f32.mrf.mxu0 }
 0x1d0   : > { %v377_v21 = vadd.f32 %v528_v20, %v310_v19 }
 0x1d1   : > { %v368_v22 = vpop.f32.mrf.mxu0 }
 0x1d2   : > { %v385_v23 = vmax.f32 %v377_v21, 0.0  ;;  %v369_v24 = vadd.f32 %v368_v22, %v300_v18 }
 0x1d3   : > { %v529_v26 = vpop.f32.mrf.mxu0 }
 0x1d4   : > { %390 = vst.msk [vmem:[%s248_s25 + $0x10] sm:$0xff] %vm387_vm3, %v385_v23  ;;  %v383_v27 = vmax.f32 %v369_v24, 0.0  ;;  %v380_v28 = vadd.f32 %v529_v26, %v315_v25 }
 0x1d5   : > { %v371_v29 = vpop.f32.mrf.mxu0 }
 0x1d6   : > { %388 = vst.msk [vmem:[%s248_s25] sm:$0xff] %vm387_vm3, %v383_v27  ;;  %v386_v30 = vmax.f32 %v380_v28, 0.0  ;;  %v372_v31 = vadd.f32 %v371_v29, %v305_v17 }
 0x1d8   : > { %391 = vst.msk [vmem:[%s248_s25 + $0x18] sm:$0xff] %vm387_vm3, %v386_v30  ;;  %v384_v32 = vmax.f32 %v372_v31, 0.0 }
 0x1da   : > { %389 = vst.msk [vmem:[%s248_s25 + $0x8] sm:$0xff] %vm387_vm3, %v384_v32 }
 0x1db PF: > { %s14_s17 = sadd.s32 1, %s589_s17   ;;  %s688_s15 = smov %s585_s16 }
 0x1dc   : > { %p11_p5 = scmp.ge.s32.totalorder %s14_s17, 4   ;;  %s689_s16 = smov %s691_s18 }
 0x1de   :  { %13 = sbr.rel (!%p11_p5) target bundleno = 2 (0x2), region = 69 }

</bundles_post_ra>
